<compile_context>
chip_gen: v5e
topology: v5e:2x2
jax: 0.10.0
libtpu: 0.0.40
codegen_flags: <defaults>
</compile_context>

<pallas_src>
import functools

import jax
import jax.numpy as jnp
from jax import lax
from jax.experimental import pallas as pl
from jax.experimental.pallas import tpu as pltpu


def sfnn_kernel(x_ref, wd_ref, wo_ref, p_ref, y_ref, *, batch):
    """x_ref: (S*B, I) time-major; wd_ref: (I, H); wo_ref: (O, H);
    p_ref: (3, H) = [b_dense; tau; b_out(padded)]; y_ref: (O, S*B)."""
    N, _ = x_ref.shape
    H = wd_ref.shape[1]
    O = wo_ref.shape[0]
    B = batch
    S = N // B

    # ---- loop-invariant params, computed once ------------------------------
    bd = p_ref[0:1, :]                                   # (1, H)
    alpha = jax.nn.sigmoid(p_ref[1:2, :])                # (1, H)
    beta = 1.0 - alpha

    # ---- ONE batched input matmul over all S*B rows (time-major) -----------
    cur_all = jnp.dot(x_ref[...], wd_ref[...],
                      preferred_element_type=jnp.float32) + bd   # (N, H)

    # ---- serial part: cheap elementwise leaky integration over time --------
    # Trajectory held in vregs (S*B*H*4 ≈ 4 KiB), no VMEM scratch round-trip.
    mem = jnp.zeros((B, H), jnp.float32)
    mems = []
    for t in range(S):                                   # static, unrolled (S small)
        mem = alpha * mem + beta * cur_all[t * B:(t + 1) * B, :]
        mems.append(mem)
    mem_all = jnp.concatenate(mems, axis=0)              # (N, H)

    # ---- output layer: lane-dense (O, N) result ------------------------------
    if O == 1:
        # Skip the MXU for a single output column: VPU multiply + lane reduce.
        z = jnp.sum(mem_all * wo_ref[...], axis=-1).reshape(1, N)   # (1, N)
        z = z + p_ref[2:3, 0:1]                                     # scalar bias
    else:
        # General O: transposed matmul so the add/sigmoid/store stay lane-dense.
        z = lax.dot_general(wo_ref[...], mem_all,
                            dimension_numbers=(((1,), (1,)), ((), ())),
                            preferred_element_type=jnp.float32)     # (O, N)
        z = z + p_ref[2:3, 0:O].reshape(O, 1)

    y_ref[...] = jax.nn.sigmoid(z).astype(y_ref.dtype)


@jax.jit
def vanilla_sfnn_forward(x, w_dense, b_dense, tau, w_out, b_out):
    """x: (B, S, I) float32  ->  (B, S, O) float32"""
    B, S, I = x.shape
    H = w_dense.shape[0]
    O = w_out.shape[0]
    N = B * S

    # Time-major flatten so per-t slices inside the kernel are contiguous
    # static slices and the in-kernel "reshape" is a no-op.
    x_flat = x.transpose(1, 0, 2).reshape(N, I)          # (S*B, I)
    wd_t = w_dense.T                                      # (I, H)

    # Pack the tiny per-H parameters into a single VMEM input (fewer DMAs).
    # (Assumes O <= H, true for this module: O=1, H=64.)
    bo_pad = jnp.zeros((H,), jnp.float32).at[:O].set(b_out)
    params = jnp.stack([b_dense, tau, bo_pad], axis=0)    # (3, H)

    cost = pl.CostEstimate(
        flops=2 * N * (I * H + H * O),
        transcendentals=H + N * O,                        # sigmoid(tau) + outputs
        bytes_accessed=4 * (N * I + I * H + O * H + 3 * H + O * N),
    )

    vmem = pltpu.MemorySpace.VMEM
    y_t = pl.pallas_call(
        functools.partial(sfnn_kernel, batch=B),
        out_shape=jax.ShapeDtypeStruct((O, N), jnp.float32),   # lane-dense output
        in_specs=[
            pl.BlockSpec(memory_space=vmem),   # x_flat  (S*B, I)
            pl.BlockSpec(memory_space=vmem),   # W_dense^T (I, H)
            pl.BlockSpec(memory_space=vmem),   # W_out   (O, H)
            pl.BlockSpec(memory_space=vmem),   # packed params (3, H)
        ],
        out_specs=pl.BlockSpec(memory_space=vmem),
        cost_estimate=cost,
    )(x_flat, wd_t, w_out, params)

    # (O, S*B) -> (B, S, O); trivial wrapper-side layout plumbing.
    return y_t.reshape(O, S, B).transpose(2, 1, 0)


def reference_forward(x, w_dense, b_dense, tau, w_out, b_out):
    """Pure-JAX reference matching the PyTorch forward."""
    B, S, _ = x.shape
    H = w_dense.shape[0]
    mem = jnp.zeros((B, H), jnp.float32)
    alpha = jax.nn.sigmoid(tau)
    outs = []
    for t in range(S):
        cur = x[:, t, :] @ w_dense.T + b_dense
        mem = alpha * mem + (1.0 - alpha) * cur
        outs.append(jax.nn.sigmoid(mem @ w_out.T + b_out))
    return jnp.stack(outs, axis=1)


if __name__ == "__main__":
    # Module hyperparameters (from __init__ defaults)
    input_size, hidden_size, output_size = 40, 64, 1
    batch, seq_len = 2, 8

    key = jax.random.PRNGKey(0)
    kx, kwd, kbd, kwo, kbo = jax.random.split(key, 5)

    # Deterministic parameter init (PyTorch-Linear-style uniform bounds)
    bound_d = 1.0 / (input_size ** 0.5)
    w_dense = jax.random.uniform(kwd, (hidden_size, input_size),
                                 minval=-bound_d, maxval=bound_d, dtype=jnp.float32)
    b_dense = jax.random.uniform(kbd, (hidden_size,),
                                 minval=-bound_d, maxval=bound_d, dtype=jnp.float32)
    bound_o = 1.0 / (hidden_size ** 0.5)
    w_out = jax.random.uniform(kwo, (output_size, hidden_size),
                               minval=-bound_o, maxval=bound_o, dtype=jnp.float32)
    b_out = jax.random.uniform(kbo, (output_size,),
                               minval=-bound_o, maxval=bound_o, dtype=jnp.float32)
    tau = jnp.ones((hidden_size,), jnp.float32) * 2.0

    x = jax.random.normal(kx, (batch, seq_len, input_size), dtype=jnp.float32)

    y = vanilla_sfnn_forward(x, w_dense, b_dense, tau, w_out, b_out)
    y = jax.block_until_ready(y)

    y_ref = reference_forward(x, w_dense, b_dense, tau, w_out, b_out)
    assert y.shape == (batch, seq_len, output_size)
    assert jnp.allclose(y, y_ref, atol=1e-5, rtol=1e-5)

    print("KERNEL_OK")
</pallas_src>

<mosaic_0001>
module attributes {stable_mosaic.version = 11 : i64} {
  func.func @sfnn_kernel(%arg0: memref<16x40xf32, #tpu.memory_space<vmem>>, %arg1: memref<40x64xf32, #tpu.memory_space<vmem>>, %arg2: memref<1x64xf32, #tpu.memory_space<vmem>>, %arg3: memref<3x64xf32, #tpu.memory_space<vmem>>, %arg4: memref<1x16xf32, #tpu.memory_space<vmem>>) attributes {dimension_semantics = [], scalar_prefetch = 0 : i64, scratch_operands = 0 : i64, tpu.core_type = #tpu.core_type<tc>} {
    %c0 = arith.constant 0 : index
    %c0_0 = arith.constant 0 : index
    %0 = vector.load %arg3[%c0, %c0_0] : memref<3x64xf32, #tpu.memory_space<vmem>>, vector<1x64xf32>
    %c1 = arith.constant 1 : index
    %c0_1 = arith.constant 0 : index
    %1 = vector.load %arg3[%c1, %c0_1] : memref<3x64xf32, #tpu.memory_space<vmem>>, vector<1x64xf32>
    %2 = arith.negf %1 : vector<1x64xf32>
    %3 = math.exp %2 : vector<1x64xf32>
    %cst = arith.constant 1.000000e+00 : f32
    %4 = vector.broadcast %cst : f32 to vector<1x64xf32>
    %5 = arith.addf %4, %3 : vector<1x64xf32>
    %6 = arith.divf %4, %5 : vector<1x64xf32>
    %cst_2 = arith.constant 1.000000e+00 : f32
    %7 = vector.broadcast %cst_2 : f32 to vector<1x64xf32>
    %8 = arith.subf %7, %6 : vector<1x64xf32>
    %c0_3 = arith.constant 0 : index
    %c0_4 = arith.constant 0 : index
    %9 = vector.load %arg0[%c0_3, %c0_4] : memref<16x40xf32, #tpu.memory_space<vmem>>, vector<16x40xf32>
    %c0_5 = arith.constant 0 : index
    %c0_6 = arith.constant 0 : index
    %10 = vector.load %arg1[%c0_5, %c0_6] : memref<40x64xf32, #tpu.memory_space<vmem>>, vector<40x64xf32>
    %cst_7 = arith.constant dense<0.000000e+00> : vector<16x64xf32>
    %11 = tpu.matmul %9, %10, %cst_7 {dimension_numbers = #tpu.dot_dimension_numbers<[1], [0], [0], [1], [0, 0, 1, 1], [], []>} : vector<16x40xf32>, vector<40x64xf32>, vector<16x64xf32> -> vector<16x64xf32>
    %12 = vector.broadcast %0 : vector<1x64xf32> to vector<16x64xf32>
    %13 = arith.addf %11, %12 : vector<16x64xf32>
    %cst_8 = arith.constant 0.000000e+00 : f32
    %14 = vector.broadcast %cst_8 : f32 to vector<2x64xf32>
    %15 = vector.broadcast %6 : vector<1x64xf32> to vector<2x64xf32>
    %16 = arith.mulf %15, %14 : vector<2x64xf32>
    %17 = vector.extract_strided_slice %13 {offsets = [0, 0], sizes = [2, 64], strides = [1, 1]} : vector<16x64xf32> to vector<2x64xf32>
    %18 = vector.broadcast %8 : vector<1x64xf32> to vector<2x64xf32>
    %19 = arith.mulf %18, %17 : vector<2x64xf32>
    %20 = arith.addf %16, %19 : vector<2x64xf32>
    %21 = vector.broadcast %6 : vector<1x64xf32> to vector<2x64xf32>
    %22 = arith.mulf %21, %20 : vector<2x64xf32>
    %23 = vector.extract_strided_slice %13 {offsets = [2, 0], sizes = [2, 64], strides = [1, 1]} : vector<16x64xf32> to vector<2x64xf32>
    %24 = vector.broadcast %8 : vector<1x64xf32> to vector<2x64xf32>
    %25 = arith.mulf %24, %23 : vector<2x64xf32>
    %26 = arith.addf %22, %25 : vector<2x64xf32>
    %27 = vector.broadcast %6 : vector<1x64xf32> to vector<2x64xf32>
    %28 = arith.mulf %27, %26 : vector<2x64xf32>
    %29 = vector.extract_strided_slice %13 {offsets = [4, 0], sizes = [2, 64], strides = [1, 1]} : vector<16x64xf32> to vector<2x64xf32>
    %30 = vector.broadcast %8 : vector<1x64xf32> to vector<2x64xf32>
    %31 = arith.mulf %30, %29 : vector<2x64xf32>
    %32 = arith.addf %28, %31 : vector<2x64xf32>
    %33 = vector.broadcast %6 : vector<1x64xf32> to vector<2x64xf32>
    %34 = arith.mulf %33, %32 : vector<2x64xf32>
    %35 = vector.extract_strided_slice %13 {offsets = [6, 0], sizes = [2, 64], strides = [1, 1]} : vector<16x64xf32> to vector<2x64xf32>
    %36 = vector.broadcast %8 : vector<1x64xf32> to vector<2x64xf32>
    %37 = arith.mulf %36, %35 : vector<2x64xf32>
    %38 = arith.addf %34, %37 : vector<2x64xf32>
    %39 = vector.broadcast %6 : vector<1x64xf32> to vector<2x64xf32>
    %40 = arith.mulf %39, %38 : vector<2x64xf32>
    %41 = vector.extract_strided_slice %13 {offsets = [8, 0], sizes = [2, 64], strides = [1, 1]} : vector<16x64xf32> to vector<2x64xf32>
    %42 = vector.broadcast %8 : vector<1x64xf32> to vector<2x64xf32>
    %43 = arith.mulf %42, %41 : vector<2x64xf32>
    %44 = arith.addf %40, %43 : vector<2x64xf32>
    %45 = vector.broadcast %6 : vector<1x64xf32> to vector<2x64xf32>
    %46 = arith.mulf %45, %44 : vector<2x64xf32>
    %47 = vector.extract_strided_slice %13 {offsets = [10, 0], sizes = [2, 64], strides = [1, 1]} : vector<16x64xf32> to vector<2x64xf32>
    %48 = vector.broadcast %8 : vector<1x64xf32> to vector<2x64xf32>
    %49 = arith.mulf %48, %47 : vector<2x64xf32>
    %50 = arith.addf %46, %49 : vector<2x64xf32>
    %51 = vector.broadcast %6 : vector<1x64xf32> to vector<2x64xf32>
    %52 = arith.mulf %51, %50 : vector<2x64xf32>
    %53 = vector.extract_strided_slice %13 {offsets = [12, 0], sizes = [2, 64], strides = [1, 1]} : vector<16x64xf32> to vector<2x64xf32>
    %54 = vector.broadcast %8 : vector<1x64xf32> to vector<2x64xf32>
    %55 = arith.mulf %54, %53 : vector<2x64xf32>
    %56 = arith.addf %52, %55 : vector<2x64xf32>
    %57 = vector.broadcast %6 : vector<1x64xf32> to vector<2x64xf32>
    %58 = arith.mulf %57, %56 : vector<2x64xf32>
    %59 = vector.extract_strided_slice %13 {offsets = [14, 0], sizes = [2, 64], strides = [1, 1]} : vector<16x64xf32> to vector<2x64xf32>
    %60 = vector.broadcast %8 : vector<1x64xf32> to vector<2x64xf32>
    %61 = arith.mulf %60, %59 : vector<2x64xf32>
    %62 = arith.addf %58, %61 : vector<2x64xf32>
    %63 = tpu.concatenate %20, %26, %32, %38, %44, %50, %56, %62 in 0 : vector<2x64xf32>, vector<2x64xf32>, vector<2x64xf32>, vector<2x64xf32>, vector<2x64xf32>, vector<2x64xf32>, vector<2x64xf32>, vector<2x64xf32> -> vector<16x64xf32>
    %c0_9 = arith.constant 0 : index
    %c0_10 = arith.constant 0 : index
    %64 = vector.load %arg2[%c0_9, %c0_10] : memref<1x64xf32, #tpu.memory_space<vmem>>, vector<1x64xf32>
    %65 = vector.broadcast %64 : vector<1x64xf32> to vector<16x64xf32>
    %66 = arith.mulf %63, %65 : vector<16x64xf32>
    %cst_11 = arith.constant dense<0.000000e+00> : vector<16xf32>
    %67 = vector.multi_reduction <add>, %66, %cst_11 [1] : vector<16x64xf32> to vector<16xf32>
    %68 = vector.shape_cast %67 : vector<16xf32> to vector<1x16xf32>
    %c2 = arith.constant 2 : index
    %c0_12 = arith.constant 0 : index
    %69 = vector.load %arg3[%c2, %c0_12] : memref<3x64xf32, #tpu.memory_space<vmem>>, vector<1x1xf32>
    %70 = vector.broadcast %69 : vector<1x1xf32> to vector<1x16xf32>
    %71 = arith.addf %68, %70 : vector<1x16xf32>
    %72 = arith.negf %71 : vector<1x16xf32>
    %73 = math.exp %72 : vector<1x16xf32>
    %cst_13 = arith.constant 1.000000e+00 : f32
    %74 = vector.broadcast %cst_13 : f32 to vector<1x16xf32>
    %75 = arith.addf %74, %73 : vector<1x16xf32>
    %76 = arith.divf %74, %75 : vector<1x16xf32>
    %c0_14 = arith.constant 0 : index
    %c0_15 = arith.constant 0 : index
    %77 = vector.load %arg4[%c0_14, %c0_15] : memref<1x16xf32, #tpu.memory_space<vmem>>, vector<1x16xf32>
    tpu.vector_store %arg4[%c0_14, %c0_15], %76 {strides = array<i32>} : memref<1x16xf32, #tpu.memory_space<vmem>>, vector<1x16xf32>,
    return
  }
}

</mosaic_0001>

<bundles_post_ra>
// kernel: vanilla_sfnn_forward.1
= control target key start
LH: loop header
LB: loop body
LE: loop exit
PB: predicated region body
PF: predicated region fallthrough
CT: control target
= control target key end

     0   :  { %v248_v2 = vmov 0   ;;  %vm47_vm0 = vcmask 326656   ;;  %vm129_vm5 = vcmask 1041408   ;;  %vm131_vm6 = vcmask 1043456   ;;  %s318_s1 = inlined_call_operand.vmem [shape: f32[40,64], index: 1, kind: input, shape index: {}]   ;;  %s319_s3 = inlined_call_operand.vmem [shape: f32[3,64], index: 3, kind: input, shape index: {}]   ;;  %s320_s0 = inlined_call_operand.vmem [shape: f32[16,40], index: 0, kind: input, shape index: {}]   ;;  %s321_s2 = inlined_call_operand.vmem [shape: f32[1,64], index: 2, kind: input, shape index: {}]   ;;  %s322_s4 = inlined_call_operand.vmem [shape: f32[1,16], index: 4, kind: output, shape index: {}]  }
   0x1   :  { %v45_v0 = vld [vmem:[%s318_s1 + $0x20] sm:$0xff]  ;;  %v44_v1 = vld [vmem:[%s318_s1 + $0x18] sm:$0xff]  ;;  %231 = vset.pattern.permute.xlu0 %v248_v2  ;;  %232 = vset.pattern.permute.xlu1 %v248_v2  ;;  %v43_v3 = vld [vmem:[%s318_s1 + $0x10] sm:$0xff]  ;;  %vm133_vm7 = vcmask 1045504   ;;  %vm144_vm8 = vcmask 523264  }
   0x2   :  { %65 = vmatpush.msra.mxu0 %v45_v0  ;;  %225 = vmatpush.msra.mxu1 %v45_v0  ;;  %v151_v4 = vld [vmem:[%s319_s3 + $0x2] sm:$0x1]  ;;  %v42_v5 = vld [vmem:[%s318_s1 + $0x8] sm:$0xff]  ;;  %v18_v9 = vld [vmem:[%s319_s3 + $0x1] sm:$0x1] }
   0x3   :  { %233 = vset.pattern.permute.xlu2 %v248_v2  ;;  %154 = vperm.xlu0 %231, %v151_v4   ;;  %v41_v6 = vld [vmem:[%s318_s1] sm:$0xff]  ;;  %v40_v8 = vld [vmem:[%s320_s0 + $0x8] sm:$0xff]  ;;  %v220_v10 = vmul.f32 -1.442695, %v18_v9 }
   0x4   :  { %66 = vmatpush.msra.mxu0 %v44_v1  ;;  %226 = vmatpush.msra.mxu1 %v44_v1  ;;  %v39_v7 = vld [vmem:[%s320_s0] sm:$0xff] }
   0x5   :  { %236 = vpow2.f32 %v220_v10  ;;  %v234_v24 = vld [vmem:[%s319_s3] ss:$0 sm:$0xff] }
   0x6   :  { %67 = vmatpush.msra.mxu0 %v43_v3  ;;  %227 = vmatpush.msra.mxu1 %v43_v3  ;;  %v235_v46 = vld [vmem:[%s321_s2] ss:$0 sm:$0xff] }
   0x8   :  { %68 = vmatpush.msra.mxu0 %v42_v5  ;;  %228 = vmatpush.msra.mxu1 %v42_v5 }
   0xa   :  { %69 = vmatpush.msra.mxu0 %v41_v6  ;;  %229 = vmatpush.msra.mxu1 %v41_v6 }
   0xb   :  { %221 = vmatmul.msk.f32.vlgmr.msra.gmra.mxu0 %vm47_vm0, %v39_v7  ;;  %222 = vmatmul.msk.f32.vlgmr.msra.gmra.mxu1 %vm47_vm0, %v40_v8  ;;  %v237_v11 = vpop.eup %236 }
   0xc   :  { %v22_v12 = vadd.f32 1.0, %v237_v11 }
   0xe   :  { %238 = vrcp.f32 %v22_v12  ;;  %vm28_vm1 = vweird.f32 %v22_v12  ;;  %v34_v17 = vand.u32 2147483648, %v22_v12  ;;  %v32_v19 = vand.u32 2147483647, %v22_v12 }
  0x10   :  { %v35_v20 = vor.u32 1.1754944e-38, %v34_v17  ;;  %vm33_vm4 = vcmp.eq.f32.partialorder %v32_v19, 8.507059e+37 }
  0x14   :  { %v239_v13 = vpop.eup %238 }
  0x15   :  { %v24_v14 = vmul.f32 %v239_v13, %v22_v12  ;;  %vm29_vm2 = vweird.f32 %v239_v13 }
  0x16   :  { %vm30_vm3 = vmor %vm28_vm1, %vm29_vm2  ;;  %vm211_vm1 = vcmask 130112   ;;  %vm214_vm2 = vcmask 122880  }
  0x17   :  { %v25_v15 = vsub.f32 1.0, %v24_v14 }
  0x19   :  { %v26_v16 = vmul.f32 %v239_v13, %v25_v15 }
  0x1b   :  { %v27_v18 = vadd.f32 %v239_v13, %v26_v16 }
  0x1d   :  { %v31_v21 = vsel %vm30_vm3, %v239_v13, %v27_v18 }
  0x1e   :  { %v36_v22 = vsel %vm33_vm4, %v35_v20, %v31_v21 }
  0x1f   :  { %v38_v23 = vsub.f32 1.0, %v36_v22  ;;  %v77_v25 = vperm.slane %v36_v22, 0 }
  0x21   :  { %v79_v26 = vperm.slane %v38_v23, 0  ;;  %v78_v29 = vmul.f32 0.0, %v77_v25 }
  0x75   :  { %v155_v8 = vpop.permute.xlu0 %154 }
  0x76   :  { %v156_v9 = vperm.slane %v155_v8, 0 }
  0x88   :  { %v71_v27 = vpop.f32.mrf.mxu0  ;;  %v74_v35 = vpop.f32.mrf.mxu1 }
  0x89   :  { %v72_v28 = vadd.f32 %v234_v24, %v71_v27  ;;  %v75_v38 = vadd.f32 %v234_v24, %v74_v35 }
  0x8b   :  { %v80_v30 = vmul.f32 %v79_v26, %v72_v28  ;;  %v96_v44 = vmul.f32 %v79_v26, %v75_v38 }
  0x8d   :  { %v81_v31 = vadd.f32 %v80_v30, %v78_v29  ;;  %v84_v33 = vrot.slane %v80_v30, 2  ;;  %v88_v36 = vrot.slane %v80_v30, 4  ;;  %v92_v40 = vrot.slane %v80_v30, 6 }
  0x8e   :  { %v100_v51 = vrot.slane %v96_v44, 2  ;;  %v104_v57 = vrot.slane %v96_v44, 4  ;;  %v108_v62 = vrot.slane %v96_v44, 6 }
  0x8f   :  { %v82_v32 = vmul.f32 %v81_v31, %v77_v25 }
  0x91   :  { %v86_v34 = vadd.f32 %v84_v33, %v82_v32 }
  0x93   :  { %v87_v37 = vmul.f32 %v86_v34, %v77_v25  ;;  %v112_v42 = vrot.slane %v86_v34, 6 }
  0x95   :  { %v90_v39 = vadd.f32 %v88_v36, %v87_v37  ;;  %v130_v48 = vsel %vm129_vm5, %v81_v31, %v112_v42 }
  0x97   :  { %v91_v41 = vmul.f32 %v90_v39, %v77_v25  ;;  %v115_v43 = vrot.slane %v90_v39, 4 }
  0x99   :  { %v94_v45 = vadd.f32 %v92_v40, %v91_v41  ;;  %v132_v50 = vsel %vm131_vm6, %v130_v48, %v115_v43  ;;  %v206_v40 = vlaneseq }
  0x9b   :  { %v118_v47 = vrot.slane %v94_v45, 2  ;;  %v95_v49 = vmul.f32 %v94_v45, %v77_v25  ;;  %v207_v41 = vand.u32 127, %v206_v40 }
  0x9d   :  { %v134_v52 = vsel %vm133_vm7, %v132_v50, %v118_v47  ;;  %v97_v53 = vadd.f32 %v96_v44, %v95_v49  ;;  %v209_v42 = vadd.s32 4294967288, %v207_v41 }
  0x9e   :  { %v142_v54 = vmul.f32 %v235_v46, %v134_v52 }
  0x9f   :  { %v98_v55 = vmul.f32 %v97_v53, %v77_v25 }
  0xa0   :  { %v145_v56 = vsel %vm144_vm8, %v142_v54, 0.0 }
  0xa1   :  { %146 = vadd.xlane.f32.xlu0 %v145_v56  ;;  %v102_v58 = vadd.f32 %v100_v51, %v98_v55 }
  0xa3   :  { %v103_v59 = vmul.f32 %v102_v58, %v77_v25  ;;  %v121_v63 = vrot.slane %v102_v58, 6 }
  0xa5   :  { %v106_v60 = vadd.f32 %v104_v57, %v103_v59  ;;  %v135_v3 = vsel %vm129_vm5, %v97_v53, %v121_v63 }
  0xa7   :  { %v107_v61 = vmul.f32 %v106_v60, %v77_v25  ;;  %v124_v0 = vrot.slane %v106_v60, 4 }
  0xa9   :  { %v110_v1 = vadd.f32 %v108_v62, %v107_v61  ;;  %v136_v4 = vsel %vm131_vm6, %v135_v3, %v124_v0 }
  0xab   :  { %v127_v2 = vrot.slane %v110_v1, 2 }
  0xad   :  { %v137_v5 = vsel %vm133_vm7, %v136_v4, %v127_v2 }
  0xae   :  { %v143_v6 = vmul.f32 %v235_v46, %v137_v5 }
  0xb0   :  { %v148_v7 = vsel %vm144_vm8, %v143_v6, 0.0 }
  0xb1   :  { %149 = vadd.xlane.f32.xlu1 %v148_v7 }
 0x114   :  { %v147_v10 = vpop.xlane.xlu0 %146 }
 0x115   :  { %v158_v11 = vadd.f32 %v156_v9, %v147_v10 }
 0x117   :  { %v223_v12 = vmul.f32 -1.442695, %v158_v11 }
 0x119   :  { %240 = vpow2.f32 %v223_v12 }
 0x11f   :  { %v241_v13 = vpop.eup %240 }
 0x120   :  { %v166_v14 = vadd.f32 1.0, %v241_v13 }
 0x122   :  { %242 = vrcp.f32 %v166_v14  ;;  %v179_v21 = vand.u32 2147483648, %v166_v14  ;;  %v177_v23 = vand.u32 2147483647, %v166_v14  ;;  %vm173_vm10 = vweird.f32 %v166_v14 }
 0x124   :  { %v150_v15 = vpop.xlane.xlu1 %149  ;;  %v180_v27 = vor.u32 1.1754944e-38, %v179_v21  ;;  %vm178_vm12 = vcmp.eq.f32.partialorder %v177_v23, 8.507059e+37 }
 0x125   :  { %v159_v16 = vadd.f32 %v156_v9, %v150_v15 }
 0x127   :  { %v224_v17 = vmul.f32 -1.442695, %v159_v16 }
 0x128   :  { %v243_v18 = vpop.eup %242 }
 0x129   :  { %244 = vpow2.f32 %v224_v17  ;;  %v169_v19 = vmul.f32 %v243_v18, %v166_v14  ;;  %vm174_vm9 = vweird.f32 %v243_v18 }
 0x12a   :  { %vm175_vm11 = vmor %vm173_vm10, %vm174_vm9 }
 0x12b   :  { %v170_v20 = vsub.f32 1.0, %v169_v19 }
 0x12d   :  { %v171_v22 = vmul.f32 %v243_v18, %v170_v20 }
 0x12f   :  { %v245_v24 = vpop.eup %244  ;;  %v172_v25 = vadd.f32 %v243_v18, %v171_v22 }
 0x130   :  { %v167_v26 = vadd.f32 1.0, %v245_v24 }
 0x131   :  { %v176_v28 = vsel %vm175_vm11, %v243_v18, %v172_v25 }
 0x132   :  { %246 = vrcp.f32 %v167_v26  ;;  %v181_v29 = vsel %vm178_vm12, %v180_v27, %v176_v28  ;;  %v194_v33 = vand.u32 2147483648, %v167_v26  ;;  %v192_v35 = vand.u32 2147483647, %v167_v26 }
 0x133   :  { %201 = vperm.xlu1 %232, %v181_v29   ;;  %vm188_vm14 = vweird.f32 %v167_v26 }
 0x134   :  { %v195_v37 = vor.u32 1.1754944e-38, %v194_v33  ;;  %vm193_vm0 = vcmp.eq.f32.partialorder %v192_v35, 8.507059e+37 }
 0x138   :  { %v247_v30 = vpop.eup %246 }
 0x139   :  { %v184_v31 = vmul.f32 %v247_v30, %v167_v26  ;;  %vm189_vm13 = vweird.f32 %v247_v30 }
 0x13a   :  { %vm190_vm15 = vmor %vm188_vm14, %vm189_vm13 }
 0x13b   :  { %v185_v32 = vsub.f32 1.0, %v184_v31 }
 0x13d   :  { %v186_v34 = vmul.f32 %v247_v30, %v185_v32 }
 0x13f   :  { %v187_v36 = vadd.f32 %v247_v30, %v186_v34 }
 0x141   :  { %v191_v38 = vsel %vm190_vm15, %v247_v30, %v187_v36 }
 0x142   :  { %v196_v39 = vsel %vm193_vm0, %v195_v37, %v191_v38 }
 0x143   :  { %204 = vperm.xlu2 %233, %v196_v39  }
 0x19d   :  { %v205_v43 = vpop.permute.xlu2 %204 }
 0x19e   :  { %v210_v45 = vperm.slane %v205_v43, %v209_v42 }
 0x1a5   :  { %v202_v44 = vpop.permute.xlu1 %201 }
 0x1a6   :  { %v208_v46 = vperm.slane %v202_v44, %v207_v41 }
 0x1a8   :  { %v212_v47 = vsel %vm211_vm1, %v210_v45, %v208_v46 }
 0x1a9   :  { %215 = vst.msk [vmem:[%s322_s4] sm:$0x1] %vm214_vm2, %v212_v47 }

</bundles_post_ra>
